<compile_context>
chip_gen: v7x
topology: tpu7x:2x2x1
jax: 0.10.0
libtpu: 0.0.40
codegen_flags: <defaults>
</compile_context>

<pallas_src>
import math

import jax
import jax.numpy as jnp
from jax.experimental import pallas as pl
from jax.experimental.pallas import tpu as pltpu

_K1 = math.sqrt(2.0 / math.pi)
_GELU_C = 0.044715
_K2 = _K1 * _GELU_C            # fold sqrt(2/pi)*0.044715 at trace time

_MAX_WIDTH = 4096              # widest lane-dense slab width we consider
_TARGET_BLOCK_BYTES = 4 * 1024 * 1024
_TARGET_GRID_STEPS = 8         # keep >= ~8 steps so pipelining / both TCs stay busy


# ----------------------------------------------------------------------------
# Hardware queries (defensive: fall back to conservative values if unavailable)
# ----------------------------------------------------------------------------
def _tpu_info():
    try:
        return pltpu.get_tpu_info()
    except Exception:
        return None


def _vmem_limit_bytes() -> int:
    info = _tpu_info()
    cap = getattr(info, "vmem_capacity_bytes", None) if info is not None else None
    if cap:
        # ~96 MiB on v5e/v6e (128 MiB physical), ~48 MiB on v7x (64 MiB per TC).
        return int(cap) * 3 // 4
    return 48 * 1024 * 1024    # safe on every generation including v7x


def _compute_dtype(wire_dtype):
    """f32 compute except bf16-wire on chips with a bf16 VPU/EUP (v6e, v7x)."""
    if wire_dtype != jnp.bfloat16:
        return jnp.float32
    info = _tpu_info()
    name = ""
    if info is not None:
        name = str(
            getattr(info, "chip_version", "") or getattr(info, "chip_name", "")
        ).lower()
    if any(tag in name for tag in ("v6", "v7")):
        return jnp.bfloat16
    return jnp.float32         # v5e and unknown: upcast (no bf16 VALU/EUP)


# ----------------------------------------------------------------------------
# Kernel
# ----------------------------------------------------------------------------
def _make_kernel(compute_dtype):
    def kernel(x_ref, o_ref):
        x = x_ref[...].astype(compute_dtype)
        # Factored tanh-GELU: 5 muls + 2 adds on the VALU, tanh on the EUP.
        x2 = x * x
        inner = x * (_K1 + _K2 * x2)        # = sqrt(2/pi)*(x + 0.044715*x^3)
        hx = 0.5 * x
        o_ref[...] = (hx + hx * jnp.tanh(inner)).astype(o_ref.dtype)

    return kernel


def _gelu_jnp(x: jax.Array) -> jax.Array:
    """Plain-JAX reference / tiny-tail path (always f32 internally)."""
    xf = x.astype(jnp.float32)
    y = 0.5 * xf * (1.0 + jnp.tanh(_K1 * (xf + _GELU_C * xf * xf * xf)))
    return y.astype(x.dtype)


# ----------------------------------------------------------------------------
# Wrapper
# ----------------------------------------------------------------------------
def _pick_slab(n: int, sublane: int):
    """Widest 128-multiple width dividing n; prefer sublane-aligned row counts."""
    fallback = None
    for w in range(_MAX_WIDTH, 127, -128):
        if n % w == 0:
            if (n // w) % sublane == 0:
                return w
            if fallback is None:
                fallback = w
    return fallback            # may be None => ragged fallback in gelu_pallas


def _gelu_slab(x2d: jax.Array, compute_dtype) -> jax.Array:
    rows, width = x2d.shape
    itemsize = jnp.dtype(x2d.dtype).itemsize
    sublane = max(8, 32 // itemsize)     # 8 (f32) / 16 (bf16) / 32 (int8, fp8)

    # ~4 MiB blocks, row count a multiple of the packed sublane count.
    block_rows = (_TARGET_BLOCK_BYTES // (width * itemsize)) // sublane * sublane
    block_rows = max(sublane, block_rows)
    # Never collapse to grid=(1,): cap block_rows so we get >= ~8 grid steps
    # (restores DMA/compute overlap and gives both v7x TCs work).
    cap = pl.cdiv(pl.cdiv(rows, _TARGET_GRID_STEPS), sublane) * sublane
    block_rows = min(block_rows, max(sublane, cap))
    block_rows = min(block_rows, pl.cdiv(rows, sublane) * sublane)
    grid = (pl.cdiv(rows, block_rows),)  # partial final block OK (elementwise)

    n = rows * width
    cost = pl.CostEstimate(
        flops=7 * n,
        transcendentals=n,
        bytes_accessed=2 * n * itemsize,
    )

    return pl.pallas_call(
        _make_kernel(compute_dtype),
        out_shape=jax.ShapeDtypeStruct((rows, width), x2d.dtype),
        grid_spec=pltpu.PrefetchScalarGridSpec(
            num_scalar_prefetch=0,
            grid=grid,
            in_specs=[pl.BlockSpec((block_rows, width), lambda i: (i, 0))],
            out_specs=pl.BlockSpec((block_rows, width), lambda i: (i, 0)),
        ),
        compiler_params=pltpu.CompilerParams(
            dimension_semantics=("parallel",),       # shard grid over v7x's 2 TCs
            vmem_limit_bytes=_vmem_limit_bytes(),    # 4 MiB blocks need > v5e default
        ),
        cost_estimate=cost,
    )(x2d)


def gelu_pallas(x: jax.Array) -> jax.Array:
    """Tanh-approx GELU, elementwise, preserving shape and dtype."""
    orig_shape = x.shape
    dtype = x.dtype
    n = x.size
    if n == 0:
        return x

    itemsize = jnp.dtype(dtype).itemsize
    sublane = max(8, 32 // itemsize)
    compute_dtype = _compute_dtype(dtype)

    flat = x.reshape(-1)
    width = _pick_slab(n, sublane)
    if width is not None:
        out2d = _gelu_slab(flat.reshape(n // width, width), compute_dtype)
        return out2d.reshape(orig_shape)

    # Ragged fallback: no 128-multiple width divides n.  Kernel on the largest
    # (sublane*width)-divisible prefix; tiny tail (< sublane*width elems) in
    # plain jnp.  No full-array pad / trailing slice => no 3x HBM traffic.
    width = 1024
    chunk = sublane * width
    n_main = (n // chunk) * chunk
    if n_main == 0:
        return _gelu_jnp(x)    # tensor smaller than one block: not worth a kernel
    out_main = _gelu_slab(flat[:n_main].reshape(n_main // width, width), compute_dtype)
    out_tail = _gelu_jnp(flat[n_main:])
    return jnp.concatenate([out_main.reshape(-1), out_tail]).reshape(orig_shape)


if __name__ == "__main__":
    key = jax.random.PRNGKey(0)
    x = jax.random.normal(key, (2, 4, 16, 16), dtype=jnp.float32)

    out = gelu_pallas(x)
    jax.block_until_ready(out)

    ref = _gelu_jnp(x)
    assert out.shape == x.shape and out.dtype == x.dtype
    # f32 wire => f32 compute path; bf16-wire-on-v6e/v7x would need a looser
    # tolerance (~1e-2 rel) because it computes in bf16.
    assert jnp.allclose(out, ref, atol=1e-5, rtol=1e-5)

    print("KERNEL_OK")
</pallas_src>

<mosaic_0001>
module attributes {stable_mosaic.version = 11 : i64} {
  func.func @kernel(%arg0: i32, %arg1: memref<8x256xf32, #tpu.memory_space<vmem>>, %arg2: memref<8x256xf32, #tpu.memory_space<vmem>>) attributes {dimension_semantics = [#tpu.dimension_semantics<parallel>], iteration_bounds = array<i64: 1>, scalar_prefetch = 0 : i64, scratch_operands = 0 : i64, tpu.core_type = #tpu.core_type<tc>, window_params = [{transform_indices = @transform_0, window_bounds = array<i64: 8, 256>}, {transform_indices = @transform_1, window_bounds = array<i64: 8, 256>}]} {
    %c0 = arith.constant 0 : index
    %c0_0 = arith.constant 0 : index
    %0 = vector.load %arg1[%c0, %c0_0] : memref<8x256xf32, #tpu.memory_space<vmem>>, vector<8x256xf32>
    %1 = arith.mulf %0, %0 : vector<8x256xf32>
    %cst = arith.constant 0.0356774069 : f32
    %2 = vector.broadcast %cst : f32 to vector<8x256xf32>
    %3 = arith.mulf %2, %1 : vector<8x256xf32>
    %cst_1 = arith.constant 0.797884583 : f32
    %4 = vector.broadcast %cst_1 : f32 to vector<8x256xf32>
    %5 = arith.addf %4, %3 : vector<8x256xf32>
    %6 = arith.mulf %0, %5 : vector<8x256xf32>
    %cst_2 = arith.constant 5.000000e-01 : f32
    %7 = vector.broadcast %cst_2 : f32 to vector<8x256xf32>
    %8 = arith.mulf %7, %0 : vector<8x256xf32>
    %9 = math.tanh %6 : vector<8x256xf32>
    %10 = arith.mulf %8, %9 : vector<8x256xf32>
    %11 = arith.addf %8, %10 : vector<8x256xf32>
    %c0_3 = arith.constant 0 : index
    %c0_4 = arith.constant 0 : index
    %12 = vector.load %arg2[%c0_3, %c0_4] : memref<8x256xf32, #tpu.memory_space<vmem>>, vector<8x256xf32>
    tpu.vector_store %arg2[%c0_3, %c0_4], %11 {strides = array<i32>} : memref<8x256xf32, #tpu.memory_space<vmem>>, vector<8x256xf32>,
    return
  }
  func.func @transform_0(%arg0: i32) -> (i32, i32) {
    %c0_i32 = arith.constant 0 : i32
    %c0_i32_0 = arith.constant 0 : i32
    return %arg0, %c0_i32 : i32, i32
  }
  func.func @transform_1(%arg0: i32) -> (i32, i32) {
    %c0_i32 = arith.constant 0 : i32
    %c0_i32_0 = arith.constant 0 : i32
    return %arg0, %c0_i32 : i32, i32
  }
}

</mosaic_0001>

<bundles_post_ra>
// kernel: tpu_custom_call.1
= control target key start
LH: loop header
LB: loop body
LE: loop exit
PB: predicated region body
PF: predicated region fallthrough
CT: control target
= control target key end

     0   :  { %6 = vsyncpa [#allocation3], 0  ;;  %s146_s0 = inlined_call_operand.hbm [shape: f32[8,256], index: 0, kind: input, shape index: {}]   ;;  %s147_s1 = inlined_call_operand.hbm [shape: f32[8,256], index: 1, kind: output, shape index: {}]  }
   0x1   :  { %7 = vsyncpa [#allocation4], 0  ;;  %s110_s6 = smov [#allocation2]   ;;  %s62_s10 = scalar_lea.hbm %s146_s0, 256 }
   0x2   :  { %s14_s7 = sshll.u32 %s110_s6, 4  ;;  %p63_p0 = scmp.ne.s32.totalorder %s146_s0, %s62_s10  ;;  %s15_s7 = int_to_ptr.vmem [resolvable:$true] %s14_s7 }
   0x3   :  { %p66_p1 = scmp.lt.u32.totalorder %s62_s10, %s146_s0 }
   0x5   :  { %p68_p2 = pnand %p66_p1, %p63_p0 }
   0x7   :  { %71 = shalt.err (!%p68_p2)
}
   0x8   :  { %s72_s15 = scalar_lea.vmem %s15_s7, 256  ;;  %p77_p4 = scmp.lt.s32.totalorder %s15_s7, %s15_s7 }
   0x9   :  { %p73_p3 = scmp.ne.s32.totalorder %s15_s7, %s72_s15  ;;  %p78_p5 = scmp.lt.s32.totalorder %s72_s15, %s72_s15 }
   0xb   :  { %p79_p6 = por %p78_p5, %p77_p4 }
   0xd   :  { %p80_p7 = pnand %p79_p6, %p73_p3 }
   0xf   :  { %83 = shalt.err (!%p80_p7)
}
  0x10   :  { %17 = dma.hbm_to_vmem [thread:$0]  %s146_s0, 256, %s15_s7, [#allocation3]  }
  0x11   :  { %106 = dma.done.wait [#allocation3], 256  }
  0x12   :  { %107 = vsyncadd [#allocation3], 4294967040  ;;  %v21_v0 = vld [vmem:[#allocation2] sm:$0xff]  ;;  %v22_v1 = vld [vmem:[#allocation2 + $0x8] sm:$0xff]  ;;  %s111_s0 = smov [#allocation5]  }
  0x13   :  { %v23_v2 = vmul.f32 %v21_v0, %v21_v0  ;;  %v24_v3 = vmul.f32 %v22_v1, %v22_v1  ;;  %v31_v10 = vmul.f32 0.5, %v21_v0  ;;  %v32_v11 = vmul.f32 0.5, %v22_v1  ;;  %s47_s18 = sshll.u32 %s111_s0, 4  ;;  %s48_s18 = int_to_ptr.vmem [resolvable:$true] %s47_s18 }
  0x14   :  { %s84_s19 = scalar_lea.vmem %s48_s18, 256  ;;  %p89_p9 = scmp.lt.s32.totalorder %s48_s18, %s48_s18 }
  0x15   :  { %v25_v4 = vmul.f32 0.035677407, %v23_v2  ;;  %v26_v5 = vmul.f32 0.035677407, %v24_v3  ;;  %p85_p8 = scmp.ne.s32.totalorder %s48_s18, %s84_s19  ;;  %p90_p10 = scmp.lt.s32.totalorder %s84_s19, %s84_s19 }
  0x17   :  { %v27_v6 = vadd.f32 0.7978846, %v25_v4  ;;  %v28_v7 = vadd.f32 0.7978846, %v26_v5  ;;  %p91_p11 = por %p90_p10, %p89_p9 }
  0x19   :  { %v29_v8 = vmul.f32 %v27_v6, %v21_v0  ;;  %v30_v9 = vmul.f32 %v28_v7, %v22_v1  ;;  %p92_p12 = pnand %p91_p11, %p85_p8 }
  0x1b   :  { %58 = vtanh.f32 %v29_v8 }
  0x1c   :  { %60 = vtanh.f32 %v30_v9 }
  0x25   :  { %v59_v12 = vpop.eup %58 }
  0x26   :  { %v61_v13 = vpop.eup %60  ;;  %v35_v14 = vmul.f32 %v59_v12, %v31_v10 }
  0x27   :  { %v36_v15 = vmul.f32 %v61_v13, %v32_v11 }
  0x28   :  { %v37_v16 = vadd.f32 %v35_v14, %v31_v10 }
  0x29   :  { %v38_v17 = vadd.f32 %v36_v15, %v32_v11 }
  0x2a   :  { %39 = vst [vmem:[#allocation5] sm:$0xff] %v37_v16 }
  0x2b   :  { %40 = vst [vmem:[#allocation5 + $0x8] sm:$0xff] %v38_v17 }
  0x2c   :  { %95 = shalt.err (!%p92_p12)
}
  0x2d   :  { %s96_s22 = scalar_lea.hbm %s147_s1, 256 }
  0x2e   :  { %p97_p13 = scmp.ne.s32.totalorder %s147_s1, %s96_s22  ;;  %p100_p0 = scmp.lt.u32.totalorder %s96_s22, %s147_s1 }
  0x30   :  { %p102_p1 = pnand %p100_p0, %p97_p13 }
  0x32   :  { %105 = shalt.err (!%p102_p1)
}
  0x33   :  { %50 = dma.vmem_to_hbm [thread:$0]  %s48_s18, 256, %s147_s1, [#allocation4]  }
  0x34   :  { %108 = dma.done.wait [#allocation4], 256  }
  0x35   :  { %109 = vsyncadd [#allocation4], 4294967040 }
  0x36   :  { %54 = vsyncpa [#allocation3], 1 }
  0x37   :  { %55 = vsyncpa [#allocation4], 1 }

</bundles_post_ra>
